<compile_context>
chip_gen: v7x
topology: tpu7x:2x2x1
jax: 0.10.0
libtpu: 0.0.40
codegen_flags: <defaults>
</compile_context>

<pallas_src>
import functools
import math
from typing import NamedTuple

import jax
import jax.numpy as jnp
from jax.experimental import pallas as pl
from jax.experimental.pallas import tpu as pltpu


def _round_up(x, m):
    return (x + m - 1) // m * m


def _vmem_capacity_bytes():
    """Physical VMEM of the attached TPU; conservative (v7x) fallback."""
    try:
        return int(pltpu.get_tpu_info().vmem_capacity_bytes)
    except Exception:  # no hardware info available -> assume smallest (v7x, 64 MiB)
        return 64 * 1024 * 1024


def _tile_candidates(full, align, cap):
    """Descending tile-size candidates: multiples of `align`, capped at `cap`."""
    top = max(align, min(_round_up(full, align), _round_up(cap, align)))
    cands = []
    t = top
    while True:
        if not cands or cands[-1] != t:
            cands.append(t)
        if t <= align:
            break
        t = max(align, _round_up(t // 2, align))
    return cands


class AgendaPlan(NamedTuple):
    source_dim: int
    agenda_dim: int
    k_pad: int
    n_pad: int
    tm_cap: int
    tn: int
    tk: int
    m_align: int
    multi_k: bool
    compute_dtype: object   # numpy dtype
    out_dtype: object       # numpy dtype
    vmem_limit_bytes: int


def plan_agenda_maker(source_dim, agenda_dim, *, compute_dtype=None,
                      out_dtype=jnp.float32, max_batch_tile=1024):
    """One-time tiling decision for Linear(source_dim, agenda_dim).

    Pass compute_dtype=jnp.bfloat16 on v6e/v7x to halve x/W HBM traffic and hit
    the bf16 MXU path (accumulation stays f32).
    """
    cdt = jnp.dtype(compute_dtype) if compute_dtype is not None else jnp.dtype(jnp.float32)
    odt = jnp.dtype(out_dtype)
    x_isz = w_isz = cdt.itemsize
    out_isz = odt.itemsize
    # Sublane packing of the M (batch) tile per compute dtype.
    m_align = {4: 8, 2: 16, 1: 32}.get(x_isz, 8)

    n128 = _round_up(agenda_dim, 128)
    k128 = _round_up(source_dim, 128)

    vmem_cap = _vmem_capacity_bytes()
    # Leave headroom for Mosaic internals: ~48 MiB on v7x (64), ~96 MiB on v5e/v6e (128).
    vmem_limit = int(min(vmem_cap - (8 << 20), (vmem_cap * 3) // 4))
    budget = vmem_limit - (2 << 20)

    def cost(tm, tn, tk, multi_k):
        # Every BlockSpec operand/result is double-buffered by the pipeline.
        c = 2 * (tm * tk * x_isz + tk * tn * w_isz + tm * tn * out_isz + tn * 4)
        if multi_k:
            c += tm * tn * 4  # f32 accumulator scratch
        return c

    tm_cands = _tile_candidates(max_batch_tile, m_align, max_batch_tile)

    # Fast path: whole reduction (K) in one tile -> no accumulator, 2-D grid;
    # with tn == n128 the weight block index is constant => VMEM-resident W.
    for tn in _tile_candidates(n128, 128, 4096):
        for tm in tm_cands:
            if cost(tm, tn, k128, False) <= budget:
                return AgendaPlan(source_dim, agenda_dim,
                                  k_pad=k128, n_pad=_round_up(n128, tn),
                                  tm_cap=tm, tn=tn, tk=k128, m_align=m_align,
                                  multi_k=False, compute_dtype=cdt,
                                  out_dtype=odt, vmem_limit_bytes=vmem_limit)

    # General path: tile K as well; f32 accumulator, K innermost ("arbitrary").
    for tk in _tile_candidates(k128, 128, 2048):
        for tn in _tile_candidates(n128, 128, 1024):
            for tm in tm_cands:
                if cost(tm, tn, tk, True) <= budget:
                    return AgendaPlan(source_dim, agenda_dim,
                                      k_pad=_round_up(k128, tk),
                                      n_pad=_round_up(n128, tn),
                                      tm_cap=tm, tn=tn, tk=tk, m_align=m_align,
                                      multi_k=True, compute_dtype=cdt,
                                      out_dtype=odt, vmem_limit_bytes=vmem_limit)

    # Last resort: minimal tiles (unreachable with any realistic VMEM budget).
    return AgendaPlan(source_dim, agenda_dim, k_pad=k128, n_pad=n128,
                      tm_cap=m_align, tn=128, tk=128, m_align=m_align,
                      multi_k=True, compute_dtype=cdt, out_dtype=odt,
                      vmem_limit_bytes=vmem_limit)


def prepare_agenda_params(plan, weight, bias):
    """One-time parameter prep (hoisted out of the per-call forward).

    Transposes W to the MXU-canonical (K, N) layout, zero-pads to lane-dense /
    tile-aligned shapes, and casts to the compute dtype.  Call once per
    parameter set and reuse the result for every forward call.
    """
    agenda_dim, source_dim = weight.shape
    assert (source_dim, agenda_dim) == (plan.source_dim, plan.agenda_dim)
    w = weight.T  # (source_dim, agenda_dim) == (K, N): no in-kernel transpose.
    if w.shape != (plan.k_pad, plan.n_pad):
        w = jnp.pad(w, ((0, plan.k_pad - source_dim), (0, plan.n_pad - agenda_dim)))
    w = w.astype(plan.compute_dtype)
    b = jnp.pad(bias.astype(jnp.float32), (0, plan.n_pad - agenda_dim))
    return {"w": w, "b": b.reshape(1, plan.n_pad)}


def _linear_kernel_single_k(x_ref, w_ref, b_ref, o_ref):
    """Whole K in one tile: no accumulator, no init/finalize phases."""
    acc = jnp.dot(x_ref[...], w_ref[...], preferred_element_type=jnp.float32)
    o_ref[...] = (acc + b_ref[...].astype(jnp.float32)).astype(o_ref.dtype)


def _linear_kernel_multi_k(x_ref, w_ref, b_ref, o_ref, acc_ref):
    """K tiled along the innermost (arbitrary) grid axis with an f32 accumulator."""
    k = pl.program_id(2)

    @pl.when(k == 0)
    def _init():
        # Fold the bias into the accumulator init (no epilogue add).
        acc_ref[...] = jnp.broadcast_to(b_ref[...].astype(jnp.float32), acc_ref.shape)

    acc_ref[...] += jnp.dot(x_ref[...], w_ref[...], preferred_element_type=jnp.float32)

    @pl.when(k == pl.num_programs(2) - 1)
    def _writeback():
        o_ref[...] = acc_ref[...].astype(o_ref.dtype)


def agenda_maker(plan, params, source_embed, *, allow_xla_bypass=True):
    """Pallas forward of AgendaMaker: (batch, source_dim) -> (batch, agenda_dim)."""
    batch, source_dim = source_embed.shape
    assert source_dim == plan.source_dim
    w, b = params["w"], params["b"]

    tm = min(plan.tm_cap, _round_up(batch, plan.m_align))
    m_pad = _round_up(batch, tm)
    n_pad, k_pad = plan.n_pad, plan.k_pad
    tn, tk = plan.tn, plan.tk

    # A standalone pallas_call at tiny shapes is pure launch/DMA overhead; let
    # XLA fuse the GEMV instead.  (The demo forces the Pallas path.)
    work_bytes = (m_pad * k_pad + k_pad * n_pad + m_pad * n_pad) * plan.compute_dtype.itemsize
    if allow_xla_bypass and work_bytes <= (512 << 10):
        w_small = w[:source_dim, :plan.agenda_dim].astype(jnp.float32)
        return (source_embed.astype(jnp.float32) @ w_small
                + b[0, :plan.agenda_dim]).astype(plan.out_dtype)

    gm = m_pad // tm
    # Small-batch megacore split: if the parallel grid collapses to one block,
    # halve N (when it stays 128-aligned) so both v7x TensorCores get work.
    if (not plan.multi_k) and gm == 1 and n_pad == tn and tn % 256 == 0:
        tn = tn // 2
    gn = n_pad // tn

    x = source_embed
    if x.shape != (m_pad, k_pad):
        x = jnp.pad(x, ((0, m_pad - batch), (0, k_pad - source_dim)))
    x = x.astype(plan.compute_dtype)

    cost = pl.CostEstimate(
        flops=2 * m_pad * n_pad * k_pad,
        transcendentals=0,
        bytes_accessed=(x.size * x.dtype.itemsize + w.size * w.dtype.itemsize
                        + b.size * 4 + m_pad * n_pad * plan.out_dtype.itemsize),
    )

    if plan.multi_k:
        gk = k_pad // tk
        out = pl.pallas_call(
            _linear_kernel_multi_k,
            out_shape=jax.ShapeDtypeStruct((m_pad, n_pad), plan.out_dtype),
            grid_spec=pltpu.PrefetchScalarGridSpec(
                num_scalar_prefetch=0,
                grid=(gm, gn, gk),
                in_specs=[
                    pl.BlockSpec((tm, tk), lambda i, j, k: (i, k)),   # x  (M, K)
                    pl.BlockSpec((tk, tn), lambda i, j, k: (k, j)),   # Wt (K, N)
                    pl.BlockSpec((1, tn), lambda i, j, k: (0, j)),    # bias
                ],
                out_specs=pl.BlockSpec((tm, tn), lambda i, j, k: (i, j)),
                scratch_shapes=[pltpu.VMEM((tm, tn), jnp.float32)],
            ),
            compiler_params=pltpu.CompilerParams(
                dimension_semantics=("parallel", "parallel", "arbitrary"),
                vmem_limit_bytes=plan.vmem_limit_bytes),
            cost_estimate=cost,
        )(x, w, b)
    else:
        out = pl.pallas_call(
            _linear_kernel_single_k,
            out_shape=jax.ShapeDtypeStruct((m_pad, n_pad), plan.out_dtype),
            grid_spec=pltpu.PrefetchScalarGridSpec(
                num_scalar_prefetch=0,
                grid=(gm, gn),
                in_specs=[
                    pl.BlockSpec((tm, k_pad), lambda i, j: (i, 0)),   # x  (M, K)
                    # Constant block index along M: with gn == 1 the whole
                    # weight stays VMEM-resident across every M tile.
                    pl.BlockSpec((k_pad, tn), lambda i, j: (0, j)),   # Wt (K, N)
                    pl.BlockSpec((1, tn), lambda i, j: (0, j)),       # bias
                ],
                out_specs=pl.BlockSpec((tm, tn), lambda i, j: (i, j)),
            ),
            compiler_params=pltpu.CompilerParams(
                dimension_semantics=("parallel", "parallel"),
                vmem_limit_bytes=plan.vmem_limit_bytes),
            cost_estimate=cost,
        )(x, w, b)

    return out[:batch, :plan.agenda_dim]


if __name__ == "__main__":
    # Small shapes consistent with the module's forward:
    #   source_embed: (batch_size, source_dim) -> agenda: (batch_size, agenda_dim)
    batch_size, source_dim, agenda_dim = 8, 32, 16

    key = jax.random.PRNGKey(0)
    k_x, k_w, k_b = jax.random.split(key, 3)

    source_embed = jax.random.normal(k_x, (batch_size, source_dim), dtype=jnp.float32)

    # Deterministic parameter init mimicking torch.nn.Linear's U(-1/sqrt(in), 1/sqrt(in)).
    bound = 1.0 / math.sqrt(source_dim)
    weight = jax.random.uniform(
        k_w, (agenda_dim, source_dim), minval=-bound, maxval=bound, dtype=jnp.float32)
    bias = jax.random.uniform(
        k_b, (agenda_dim,), minval=-bound, maxval=bound, dtype=jnp.float32)

    # One-time planning + parameter prep (pad / transpose / cast hoisted out of
    # the per-call path).  On v6e/v7x pass compute_dtype=jnp.bfloat16 for the
    # bf16 MXU path; kept f32 here so the 1e-5 exactness check holds.
    plan = plan_agenda_maker(source_dim, agenda_dim)
    params = prepare_agenda_params(plan, weight, bias)

    # allow_xla_bypass=False so the demo actually exercises the Pallas kernel.
    fwd = jax.jit(functools.partial(agenda_maker, plan, allow_xla_bypass=False))
    agenda = jax.block_until_ready(fwd(params, source_embed))

    # Pure-JAX reference check of the Linear semantics.
    ref = source_embed @ weight.T + bias
    assert agenda.shape == (batch_size, agenda_dim)
    assert jnp.allclose(agenda, ref, atol=1e-5, rtol=1e-5)

    print("KERNEL_OK")
</pallas_src>

<mosaic_0001>
module attributes {stable_mosaic.version = 11 : i64} {
  func.func @_linear_kernel_single_k(%arg0: i32, %arg1: i32, %arg2: memref<8x128xf32, #tpu.memory_space<vmem>>, %arg3: memref<128x128xf32, #tpu.memory_space<vmem>>, %arg4: memref<1x128xf32, #tpu.memory_space<vmem>>, %arg5: memref<8x128xf32, #tpu.memory_space<vmem>>) attributes {dimension_semantics = [#tpu.dimension_semantics<parallel>, #tpu.dimension_semantics<parallel>], iteration_bounds = array<i64: 1, 1>, scalar_prefetch = 0 : i64, scratch_operands = 0 : i64, tpu.core_type = #tpu.core_type<tc>, window_params = [{transform_indices = @transform_0, window_bounds = array<i64: 8, 128>}, {transform_indices = @transform_1, window_bounds = array<i64: 128, 128>}, {transform_indices = @transform_2, window_bounds = array<i64: 1, 128>}, {transform_indices = @transform_3, window_bounds = array<i64: 8, 128>}]} {
    %c0 = arith.constant 0 : index
    %c0_0 = arith.constant 0 : index
    %0 = vector.load %arg2[%c0, %c0_0] : memref<8x128xf32, #tpu.memory_space<vmem>>, vector<8x128xf32>
    %c0_1 = arith.constant 0 : index
    %c0_2 = arith.constant 0 : index
    %1 = vector.load %arg3[%c0_1, %c0_2] : memref<128x128xf32, #tpu.memory_space<vmem>>, vector<128x128xf32>
    %cst = arith.constant dense<0.000000e+00> : vector<8x128xf32>
    %2 = tpu.matmul %0, %1, %cst {dimension_numbers = #tpu.dot_dimension_numbers<[1], [0], [0], [1], [0, 0, 1, 1], [], []>} : vector<8x128xf32>, vector<128x128xf32>, vector<8x128xf32> -> vector<8x128xf32>
    %c0_3 = arith.constant 0 : index
    %c0_4 = arith.constant 0 : index
    %3 = vector.load %arg4[%c0_3, %c0_4] : memref<1x128xf32, #tpu.memory_space<vmem>>, vector<1x128xf32>
    %4 = vector.broadcast %3 : vector<1x128xf32> to vector<8x128xf32>
    %5 = arith.addf %2, %4 : vector<8x128xf32>
    %c0_5 = arith.constant 0 : index
    %c0_6 = arith.constant 0 : index
    %6 = vector.load %arg5[%c0_5, %c0_6] : memref<8x128xf32, #tpu.memory_space<vmem>>, vector<8x128xf32>
    tpu.vector_store %arg5[%c0_5, %c0_6], %5 {strides = array<i32>} : memref<8x128xf32, #tpu.memory_space<vmem>>, vector<8x128xf32>,
    return
  }
  func.func @transform_0(%arg0: i32, %arg1: i32) -> (i32, i32) {
    %c0_i32 = arith.constant 0 : i32
    %c0_i32_0 = arith.constant 0 : i32
    return %arg0, %c0_i32 : i32, i32
  }
  func.func @transform_1(%arg0: i32, %arg1: i32) -> (i32, i32) {
    %c0_i32 = arith.constant 0 : i32
    %c0_i32_0 = arith.constant 0 : i32
    return %c0_i32, %arg1 : i32, i32
  }
  func.func @transform_2(%arg0: i32, %arg1: i32) -> (i32, i32) {
    %c0_i32 = arith.constant 0 : i32
    %c0_i32_0 = arith.constant 0 : i32
    return %c0_i32, %arg1 : i32, i32
  }
  func.func @transform_3(%arg0: i32, %arg1: i32) -> (i32, i32) {
    %c0_i32 = arith.constant 0 : i32
    return %arg0, %arg1 : i32, i32
  }
}

</mosaic_0001>

<bundles_post_ra>
// kernel: agenda_maker.1
= control target key start
LH: loop header
LB: loop body
LE: loop exit
PB: predicated region body
PF: predicated region fallthrough
CT: control target
= control target key end

     0   :  { %8 = vsyncpa [#allocation3], 0  ;;  %s328_s0 = inlined_call_operand.vmem [shape: f32[8,128], index: 0, kind: input, shape index: {}]   ;;  %s329_s1 = inlined_call_operand.hbm [shape: f32[128,128], index: 1, kind: input, shape index: {}]   ;;  %s330_s2 = inlined_call_operand.vmem [shape: f32[1,128], index: 2, kind: input, shape index: {}]   ;;  %s331_s3 = inlined_call_operand.hbm [shape: f32[8,128], index: 3, kind: output, shape index: {}]  }
   0x1   :  { %9 = vsyncpa [#allocation4], 0  ;;  %s271_s12 = smov [#allocation2]   ;;  %s223_s16 = scalar_lea.hbm %s329_s1, 2048 }
   0x2   :  { %s17_s13 = sshll.u32 %s271_s12, 4  ;;  %p224_p0 = scmp.ne.s32.totalorder %s329_s1, %s223_s16  ;;  %s18_s13 = int_to_ptr.vmem [resolvable:$true] %s17_s13 }
   0x3   :  { %p227_p1 = scmp.lt.u32.totalorder %s223_s16, %s329_s1 }
   0x5   :  { %p229_p2 = pnand %p227_p1, %p224_p0 }
   0x7   :  { %232 = shalt.err (!%p229_p2)
}
   0x8   :  { %s233_s21 = scalar_lea.vmem %s18_s13, 2048  ;;  %p238_p4 = scmp.lt.s32.totalorder %s18_s13, %s18_s13 }
   0x9   :  { %p234_p3 = scmp.ne.s32.totalorder %s18_s13, %s233_s21  ;;  %p239_p5 = scmp.lt.s32.totalorder %s233_s21, %s233_s21 }
   0xb   :  { %p240_p6 = por %p239_p5, %p238_p4 }
   0xd   :  { %p241_p7 = pnand %p240_p6, %p234_p3 }
   0xf   :  { %244 = shalt.err (!%p241_p7)
}
  0x10   :  { %s272_s22 = smov 128   ;;  %s273_s23 = smov 8  }
  0x11   :  { %23 = dma.hbm_to_vmem [thread:$0]  %s329_s1, 2048, %s18_s13, [#allocation3], %s272_s22, %s272_s22, %s273_s23  }
  0x12   :  { %267 = dma.done.wait [#allocation3], 2048  }
  0x13   :  { %268 = vsyncadd [#allocation3], 4294965248  ;;  %v274_v0 = vmov 0.0|0.0   ;;  %vm275_vm0 = vmmov 0   ;;  %v276_v1 = vmov 0.0   ;;  %v30_v2 = vld [vmem:[#allocation2] sm:$0xff] }
  0x14   :  { %192 = vmatprep.subr.bf16.mxu0 %v274_v0  ;;  %189 = vmatprep.mubr.msk.f32.mxu0 %vm275_vm0, %v276_v1  ;;  %v31_v3 = vld [vmem:[#allocation2 + $0x8] sm:$0xff]  ;;  %v32_v4 = vld [vmem:[#allocation2 + $0x10] sm:$0xff]  ;;  %v33_v6 = vld [vmem:[#allocation2 + $0x18] sm:$0xff]  ;;  %s277_s29 = smov [#allocation5]  }
  0x15   :  { %v193_v5 = vpack.c.bf16 %v31_v3, %v30_v2  ;;  %v196_v7 = vpack.c.bf16 %v33_v6, %v32_v4  ;;  %v34_v8 = vld [vmem:[#allocation2 + $0x20] sm:$0xff]  ;;  %v35_v9 = vld [vmem:[#allocation2 + $0x28] sm:$0xff]  ;;  %v36_v11 = vld [vmem:[#allocation2 + $0x30] sm:$0xff]  ;;  %s130_s30 = sshll.u32 %s277_s29, 4  ;;  %s131_s30 = int_to_ptr.vmem [resolvable:$true] %s130_s30 }
  0x16   :  { %v199_v10 = vpack.c.bf16 %v35_v9, %v34_v8  ;;  %v37_v12 = vld [vmem:[#allocation2 + $0x38] sm:$0xff]  ;;  %v38_v14 = vld [vmem:[#allocation2 + $0x40] sm:$0xff]  ;;  %v39_v15 = vld [vmem:[#allocation2 + $0x48] sm:$0xff]  ;;  %s245_s4 = scalar_lea.vmem %s131_s30, 128  ;;  %p250_p9 = scmp.lt.s32.totalorder %s131_s30, %s131_s30 }
  0x17   :  { %194 = vmatpush3.bf16.msra.mxu0 %v193_v5  ;;  %v202_v13 = vpack.c.bf16 %v37_v12, %v36_v11  ;;  %v205_v16 = vpack.c.bf16 %v39_v15, %v38_v14  ;;  %v40_v17 = vld [vmem:[#allocation2 + $0x50] sm:$0xff]  ;;  %v41_v18 = vld [vmem:[#allocation2 + $0x58] sm:$0xff]  ;;  %v42_v20 = vld [vmem:[#allocation2 + $0x60] sm:$0xff]  ;;  %p246_p8 = scmp.ne.s32.totalorder %s131_s30, %s245_s4  ;;  %p251_p10 = scmp.lt.s32.totalorder %s245_s4, %s245_s4 }
  0x18   :  { %195 = vmatprep.subr.bf16.mxu0 %v274_v0  ;;  %v208_v19 = vpack.c.bf16 %v41_v18, %v40_v17  ;;  %v43_v21 = vld [vmem:[#allocation2 + $0x68] sm:$0xff]  ;;  %v44_v23 = vld [vmem:[#allocation2 + $0x70] sm:$0xff]  ;;  %v45_v24 = vld [vmem:[#allocation2 + $0x78] sm:$0xff] }
  0x19   :  { %v211_v22 = vpack.c.bf16 %v43_v21, %v42_v20  ;;  %v214_v25 = vpack.c.bf16 %v45_v24, %v44_v23  ;;  %v29_v26 = vld [vmem:[%s328_s0] sm:$0xff]  ;;  %p252_p11 = por %p251_p10, %p250_p9 }
  0x1a   :  { %v139_v27 = vld [vmem:[%s330_s2] ss:$0 sm:$0xff] }
  0x1b   :  { %197 = vmatpush3.bf16.msra.mxu0 %v196_v7  ;;  %p253_p12 = pnand %p252_p11, %p246_p8 }
  0x1c   :  { %198 = vmatprep.subr.bf16.mxu0 %v274_v0 }
  0x1f   :  { %200 = vmatpush3.bf16.msra.mxu0 %v199_v10 }
  0x20   :  { %201 = vmatprep.subr.bf16.mxu0 %v274_v0 }
  0x23   :  { %203 = vmatpush3.bf16.msra.mxu0 %v202_v13 }
  0x24   :  { %204 = vmatprep.subr.bf16.mxu0 %v274_v0 }
  0x27   :  { %206 = vmatpush3.bf16.msra.mxu0 %v205_v16 }
  0x28   :  { %207 = vmatprep.subr.bf16.mxu0 %v274_v0 }
  0x2b   :  { %209 = vmatpush3.bf16.msra.mxu0 %v208_v19 }
  0x2c   :  { %210 = vmatprep.subr.bf16.mxu0 %v274_v0 }
  0x2f   :  { %212 = vmatpush3.bf16.msra.mxu0 %v211_v22 }
  0x30   :  { %213 = vmatprep.subr.bf16.mxu0 %v274_v0 }
  0x33   :  { %215 = vmatpush3.bf16.msra.mxu0 %v214_v25 }
  0x36   :  { %190 = vmatmul.mubr.f32.vlgmr.msra.gmra.mrb[0].mxu0 %v29_v26 }
 0x109   :  { %v119_v28 = vpop.f32.mrb[0].mxu0 }
 0x10a   :  { %v120_v29 = vadd.f32 %v139_v27, %v119_v28  ;;  %v191_v30 = vpop.f32.mrb[1].mxu0 }
 0x10c   :  { %123 = vst [vmem:[#allocation5] sm:$0xff] %v120_v29 }
 0x10d   :  { %256 = shalt.err (!%p253_p12)
}
 0x10e   :  { %s257_s6 = scalar_lea.hbm %s331_s3, 128 }
 0x10f   :  { %p258_p13 = scmp.ne.s32.totalorder %s331_s3, %s257_s6  ;;  %p261_p0 = scmp.lt.u32.totalorder %s257_s6, %s331_s3 }
 0x111   :  { %p263_p1 = pnand %p261_p0, %p258_p13 }
 0x113   :  { %266 = shalt.err (!%p263_p1)
}
 0x114   :  { %133 = dma.vmem_to_hbm [thread:$0]  %s131_s30, 128, %s331_s3, [#allocation4]  }
 0x115   :  { %269 = dma.done.wait [#allocation4], 128  }
 0x116   :  { %270 = vsyncadd [#allocation4], 4294967168 }
 0x117   :  { %137 = vsyncpa [#allocation3], 1 }
 0x118   :  { %138 = vsyncpa [#allocation4], 1 }

</bundles_post_ra>
